<compile_context>
chip_gen: v7x
topology: tpu7x:2x2x1
jax: 0.10.0
libtpu: 0.0.40
codegen_flags: <defaults>
</compile_context>

<pallas_src>
import jax
import jax.numpy as jnp
from jax.experimental import pallas as pl
from jax.experimental.pallas import tpu as pltpu

NEG_SLOPE = 0.01  # nn.LeakyReLU() default


def _leaky_relu(v):
    # Identical to LeakyReLU for slope in (0, 1); cheaper than cmp+mul+select.
    return jnp.maximum(v, NEG_SLOPE * v)


def _round_up(n, m):
    return ((n + m - 1) // m) * m


def resblock_kernel(x_ref, w1_ref, b1_ref, w2_ref, b2_ref, o_ref):
    # fc1 + LeakyReLU: native-dtype MXU operands, f32 accumulation, f32 epilogue.
    h = jnp.dot(x_ref[...], w1_ref[...], preferred_element_type=jnp.float32)
    h = _leaky_relu(h + b1_ref[...].astype(jnp.float32))

    # fc2 + LeakyReLU: second matmul operand back in the weights' native dtype.
    h = h.astype(w2_ref.dtype)
    z = jnp.dot(h, w2_ref[...], preferred_element_type=jnp.float32)
    z = _leaky_relu(z + b2_ref[...].astype(jnp.float32))

    # Residual: re-read x from VMEM here (do not keep the tile live across both
    # matmuls), f32 add, single cast at the store.
    o_ref[...] = (z + x_ref[...].astype(jnp.float32)).astype(o_ref.dtype)


def _vmem_cap_bytes():
    # ~7/8 of physical VMEM leaves headroom for Mosaic internal scratch:
    # ~56 MiB on v7x (64 MiB phys), ~112 MiB on v5e/v6e (128 MiB phys).
    try:
        phys = int(pltpu.get_tpu_info().vmem_capacity_bytes)
    except Exception:
        phys = 64 << 20  # conservative (v7x-sized) fallback
    return (phys * 7) // 8


def _build_call(TB, Dp, Bp, act_dtype, par_dtype, single_buffer_weights):
    w_bufs = 1 if single_buffer_weights else 2
    act_bytes = jnp.dtype(act_dtype).itemsize
    par_bytes = jnp.dtype(par_dtype).itemsize

    need = 2 * 2 * TB * Dp * act_bytes          # x + out, double-buffered
    need += w_bufs * 2 * Dp * Dp * par_bytes    # W1 + W2 (resident)
    need += w_bufs * 2 * Dp * 4                 # b1 + b2
    need += 3 * TB * Dp * 4                     # f32 intermediates headroom
    vmem_limit = int(min(max(need + (4 << 20), 16 << 20), _vmem_cap_bytes()))

    w_kwargs = {"pipeline_mode": pl.Buffered(1)} if single_buffer_weights else {}
    in_specs = [
        pl.BlockSpec((TB, Dp), lambda i: (i, 0)),                # x: streamed
        pl.BlockSpec((Dp, Dp), lambda i: (0, 0), **w_kwargs),    # W1: resident
        pl.BlockSpec((1, Dp), lambda i: (0, 0), **w_kwargs),     # b1: resident
        pl.BlockSpec((Dp, Dp), lambda i: (0, 0), **w_kwargs),    # W2: resident
        pl.BlockSpec((1, Dp), lambda i: (0, 0), **w_kwargs),     # b2: resident
    ]
    return pl.pallas_call(
        resblock_kernel,
        out_shape=jax.ShapeDtypeStruct((Bp, Dp), act_dtype),
        grid_spec=pl.GridSpec(
            grid=(Bp // TB,),
            in_specs=in_specs,
            out_specs=pl.BlockSpec((TB, Dp), lambda i: (i, 0)),
        ),
        compiler_params=pltpu.CompilerParams(
            dimension_semantics=("parallel",),
            vmem_limit_bytes=vmem_limit,
        ),
    )


def resblock(x, w1, b1, w2, b2, *, block_b=None, matmul_dtype=None):
    """x: (B, D); w1: (D, H); b1: (H,); w2: (H, H); b2: (H,). Requires D == H.

    matmul_dtype: optional (e.g. jnp.bfloat16) cast of x/W1/W2 at the call site
    so the MXU runs in its native low-precision mode; accumulation stays f32.
    Output dtype follows the (possibly cast) activation dtype.
    """
    B, D = x.shape
    H = w1.shape[1]
    assert D == H, "residual add requires input_dim == hidden_dim"

    if matmul_dtype is not None:
        x = x.astype(matmul_dtype)
        w1 = w1.astype(matmul_dtype)
        w2 = w2.astype(matmul_dtype)
    act_dtype = x.dtype
    par_dtype = w1.dtype

    sublane = 16 if act_dtype == jnp.bfloat16 else 8
    lane = 128

    # Lane-dense feature padding (unmasked stores, full MXU N/K tiles).
    Dp = _round_up(D, lane)

    # Large batch tiles: streamed x/out are the only HBM traffic.
    if block_b is None:
        block_b = 2048 if Dp <= 256 else 1024

    TB = _round_up(min(block_b, max(B, 1)), sublane)
    # Keep >=2 batch tiles when possible so "parallel" can use both v7x cores.
    if B >= 2 * sublane:
        TB = min(TB, _round_up(-(-B // 2), sublane))
    Bp = _round_up(B, TB)

    pad_b = Bp - B
    pad_d = Dp - D
    # Skip pad/slice HBM round-trips when shapes are already aligned.
    xp = x if (pad_b == 0 and pad_d == 0) else jnp.pad(x, ((0, pad_b), (0, pad_d)))
    w1p = w1 if pad_d == 0 else jnp.pad(w1, ((0, pad_d), (0, pad_d)))
    w2p = w2 if pad_d == 0 else jnp.pad(w2, ((0, pad_d), (0, pad_d)))
    b1p = (b1 if pad_d == 0 else jnp.pad(b1, (0, pad_d))).reshape(1, Dp)
    b2p = (b2 if pad_d == 0 else jnp.pad(b2, (0, pad_d))).reshape(1, Dp)

    try:
        call = _build_call(TB, Dp, Bp, act_dtype, par_dtype, single_buffer_weights=True)
        out = call(xp, w1p, b1p, w2p, b2p)
    except Exception:
        # Fallback if this jax build rejects pl.Buffered(1) single-buffering.
        call = _build_call(TB, Dp, Bp, act_dtype, par_dtype, single_buffer_weights=False)
        out = call(xp, w1p, b1p, w2p, b2p)

    if pad_b or pad_d:
        out = out[:B, :H]
    return out


def resblock_ref(x, w1, b1, w2, b2):
    """Pure-JAX reference matching the PyTorch forward."""
    h = x @ w1 + b1
    h = jnp.where(h >= 0, h, NEG_SLOPE * h)
    z = h @ w2 + b2
    z = jnp.where(z >= 0, z, NEG_SLOPE * z)
    return z + x


if __name__ == "__main__":
    key = jax.random.PRNGKey(0)
    B, D = 64, 32          # batch=64, input_dim = hidden_dim = 32
    H = D

    kx, k1, k2, k3, k4 = jax.random.split(key, 5)
    x = jax.random.normal(kx, (B, D), dtype=jnp.float32)
    # PyTorch shapes would be fc1 (H, D), fc2 (H, H); stored pre-transposed.
    w1 = jax.random.normal(k1, (D, H), dtype=jnp.float32) * 0.1
    b1 = jax.random.normal(k2, (H,), dtype=jnp.float32) * 0.1
    w2 = jax.random.normal(k3, (H, H), dtype=jnp.float32) * 0.1
    b2 = jax.random.normal(k4, (H,), dtype=jnp.float32) * 0.1

    ref = resblock_ref(x, w1, b1, w2, b2)

    # Default config: f32 operands, 2-tile grid (exercises the parallel axis).
    out = resblock(x, w1, b1, w2, b2)
    jax.block_until_ready(out)
    assert out.shape == (B, H)
    assert jnp.allclose(out, ref, atol=1e-5, rtol=1e-5), "mismatch vs reference"

    # Forced small tile -> 4-step pipelined grid.
    out2 = resblock(x, w1, b1, w2, b2, block_b=16)
    jax.block_until_ready(out2)
    assert jnp.allclose(out2, ref, atol=1e-5, rtol=1e-5), "mismatch vs reference"

    # bf16 MXU-operand path (f32 accumulation), looser tolerance.
    out_bf16 = resblock(x, w1, b1, w2, b2, matmul_dtype=jnp.bfloat16)
    jax.block_until_ready(out_bf16)
    assert jnp.allclose(out_bf16.astype(jnp.float32), ref, atol=1e-1, rtol=1e-1), \
        "bf16 path mismatch vs reference"

    print("KERNEL_OK")
</pallas_src>

<mosaic_0001>
module attributes {stable_mosaic.version = 11 : i64} {
  func.func @resblock_kernel(%arg0: i32, %arg1: memref<32x128xf32, #tpu.memory_space<vmem>>, %arg2: memref<128x128xf32, #tpu.memory_space<vmem>>, %arg3: memref<1x128xf32, #tpu.memory_space<vmem>>, %arg4: memref<128x128xf32, #tpu.memory_space<vmem>>, %arg5: memref<1x128xf32, #tpu.memory_space<vmem>>, %arg6: memref<32x128xf32, #tpu.memory_space<vmem>>) attributes {dimension_semantics = [#tpu.dimension_semantics<parallel>], iteration_bounds = array<i64: 2>, scalar_prefetch = 0 : i64, scratch_operands = 0 : i64, tpu.core_type = #tpu.core_type<tc>, window_params = [{transform_indices = @transform_0, window_bounds = array<i64: 32, 128>}, {pipeline_mode = #tpu.pipeline_mode<synchronous>, transform_indices = @transform_1, window_bounds = array<i64: 128, 128>}, {pipeline_mode = #tpu.pipeline_mode<synchronous>, transform_indices = @transform_2, window_bounds = array<i64: 1, 128>}, {pipeline_mode = #tpu.pipeline_mode<synchronous>, transform_indices = @transform_3, window_bounds = array<i64: 128, 128>}, {pipeline_mode = #tpu.pipeline_mode<synchronous>, transform_indices = @transform_4, window_bounds = array<i64: 1, 128>}, {transform_indices = @transform_5, window_bounds = array<i64: 32, 128>}]} {
    %c0 = arith.constant 0 : index
    %c0_0 = arith.constant 0 : index
    %0 = vector.load %arg1[%c0, %c0_0] : memref<32x128xf32, #tpu.memory_space<vmem>>, vector<32x128xf32>
    %c0_1 = arith.constant 0 : index
    %c0_2 = arith.constant 0 : index
    %1 = vector.load %arg2[%c0_1, %c0_2] : memref<128x128xf32, #tpu.memory_space<vmem>>, vector<128x128xf32>
    %cst = arith.constant dense<0.000000e+00> : vector<32x128xf32>
    %2 = tpu.matmul %0, %1, %cst {dimension_numbers = #tpu.dot_dimension_numbers<[1], [0], [0], [1], [0, 0, 1, 1], [], []>} : vector<32x128xf32>, vector<128x128xf32>, vector<32x128xf32> -> vector<32x128xf32>
    %c0_3 = arith.constant 0 : index
    %c0_4 = arith.constant 0 : index
    %3 = vector.load %arg3[%c0_3, %c0_4] : memref<1x128xf32, #tpu.memory_space<vmem>>, vector<1x128xf32>
    %4 = vector.broadcast %3 : vector<1x128xf32> to vector<32x128xf32>
    %5 = arith.addf %2, %4 : vector<32x128xf32>
    %cst_5 = arith.constant 0.00999999977 : f32
    %6 = vector.broadcast %cst_5 : f32 to vector<32x128xf32>
    %7 = arith.mulf %6, %5 : vector<32x128xf32>
    %8 = arith.maximumf %5, %7 : vector<32x128xf32>
    %c0_6 = arith.constant 0 : index
    %c0_7 = arith.constant 0 : index
    %9 = vector.load %arg4[%c0_6, %c0_7] : memref<128x128xf32, #tpu.memory_space<vmem>>, vector<128x128xf32>
    %cst_8 = arith.constant dense<0.000000e+00> : vector<32x128xf32>
    %10 = tpu.matmul %8, %9, %cst_8 {dimension_numbers = #tpu.dot_dimension_numbers<[1], [0], [0], [1], [0, 0, 1, 1], [], []>} : vector<32x128xf32>, vector<128x128xf32>, vector<32x128xf32> -> vector<32x128xf32>
    %c0_9 = arith.constant 0 : index
    %c0_10 = arith.constant 0 : index
    %11 = vector.load %arg5[%c0_9, %c0_10] : memref<1x128xf32, #tpu.memory_space<vmem>>, vector<1x128xf32>
    %12 = vector.broadcast %11 : vector<1x128xf32> to vector<32x128xf32>
    %13 = arith.addf %10, %12 : vector<32x128xf32>
    %cst_11 = arith.constant 0.00999999977 : f32
    %14 = vector.broadcast %cst_11 : f32 to vector<32x128xf32>
    %15 = arith.mulf %14, %13 : vector<32x128xf32>
    %16 = arith.maximumf %13, %15 : vector<32x128xf32>
    %c0_12 = arith.constant 0 : index
    %c0_13 = arith.constant 0 : index
    %17 = vector.load %arg1[%c0_12, %c0_13] : memref<32x128xf32, #tpu.memory_space<vmem>>, vector<32x128xf32>
    %18 = arith.addf %16, %17 : vector<32x128xf32>
    %c0_14 = arith.constant 0 : index
    %c0_15 = arith.constant 0 : index
    %19 = vector.load %arg6[%c0_14, %c0_15] : memref<32x128xf32, #tpu.memory_space<vmem>>, vector<32x128xf32>
    tpu.vector_store %arg6[%c0_14, %c0_15], %18 {strides = array<i32>} : memref<32x128xf32, #tpu.memory_space<vmem>>, vector<32x128xf32>,
    return
  }
  func.func @transform_0(%arg0: i32) -> (i32, i32) {
    %c0_i32 = arith.constant 0 : i32
    %c0_i32_0 = arith.constant 0 : i32
    return %arg0, %c0_i32 : i32, i32
  }
  func.func @transform_1(%arg0: i32) -> (i32, i32) {
    %c0_i32 = arith.constant 0 : i32
    %c0_i32_0 = arith.constant 0 : i32
    %c0_i32_1 = arith.constant 0 : i32
    return %c0_i32, %c0_i32_0 : i32, i32
  }
  func.func @transform_2(%arg0: i32) -> (i32, i32) {
    %c0_i32 = arith.constant 0 : i32
    %c0_i32_0 = arith.constant 0 : i32
    %c0_i32_1 = arith.constant 0 : i32
    return %c0_i32, %c0_i32_0 : i32, i32
  }
  func.func @transform_3(%arg0: i32) -> (i32, i32) {
    %c0_i32 = arith.constant 0 : i32
    %c0_i32_0 = arith.constant 0 : i32
    %c0_i32_1 = arith.constant 0 : i32
    return %c0_i32, %c0_i32_0 : i32, i32
  }
  func.func @transform_4(%arg0: i32) -> (i32, i32) {
    %c0_i32 = arith.constant 0 : i32
    %c0_i32_0 = arith.constant 0 : i32
    %c0_i32_1 = arith.constant 0 : i32
    return %c0_i32, %c0_i32_0 : i32, i32
  }
  func.func @transform_5(%arg0: i32) -> (i32, i32) {
    %c0_i32 = arith.constant 0 : i32
    %c0_i32_0 = arith.constant 0 : i32
    return %arg0, %c0_i32 : i32, i32
  }
}

module attributes {stable_mosaic.version = 11 : i64} {
  func.func @resblock_kernel(%arg0: i32, %arg1: memref<32x128xf32, #tpu.memory_space<vmem>>, %arg2: memref<128x128xf32, #tpu.memory_space<vmem>>, %arg3: memref<1x128xf32, #tpu.memory_space<vmem>>, %arg4: memref<128x128xf32, #tpu.memory_space<vmem>>, %arg5: memref<1x128xf32, #tpu.memory_space<vmem>>, %arg6: memref<32x128xf32, #tpu.memory_space<vmem>>) attributes {dimension_semantics = [#tpu.dimension_semantics<parallel>], iteration_bounds = array<i64: 2>, scalar_prefetch = 0 : i64, scratch_operands = 0 : i64, tpu.core_type = #tpu.core_type<tc>, window_params = [{transform_indices = @transform_0, window_bounds = array<i64: 32, 128>}, {pipeline_mode = #tpu.pipeline_mode<synchronous>, transform_indices = @transform_1, window_bounds = array<i64: 128, 128>}, {pipeline_mode = #tpu.pipeline_mode<synchronous>, transform_indices = @transform_2, window_bounds = array<i64: 1, 128>}, {pipeline_mode = #tpu.pipeline_mode<synchronous>, transform_indices = @transform_3, window_bounds = array<i64: 128, 128>}, {pipeline_mode = #tpu.pipeline_mode<synchronous>, transform_indices = @transform_4, window_bounds = array<i64: 1, 128>}, {transform_indices = @transform_5, window_bounds = array<i64: 32, 128>}]} {
    %c0 = arith.constant 0 : index
    %c0_0 = arith.constant 0 : index
    %0 = vector.load %arg1[%c0, %c0_0] : memref<32x128xf32, #tpu.memory_space<vmem>>, vector<32x128xf32>
    %c0_1 = arith.constant 0 : index
    %c0_2 = arith.constant 0 : index
    %1 = vector.load %arg2[%c0_1, %c0_2] : memref<128x128xf32, #tpu.memory_space<vmem>>, vector<128x128xf32>
    %cst = arith.constant dense<0.000000e+00> : vector<32x128xf32>
    %2 = tpu.matmul %0, %1, %cst {dimension_numbers = #tpu.dot_dimension_numbers<[1], [0], [0], [1], [0, 0, 1, 1], [], []>} : vector<32x128xf32>, vector<128x128xf32>, vector<32x128xf32> -> vector<32x128xf32>
    %c0_3 = arith.constant 0 : index
    %c0_4 = arith.constant 0 : index
    %3 = vector.load %arg3[%c0_3, %c0_4] : memref<1x128xf32, #tpu.memory_space<vmem>>, vector<1x128xf32>
    %4 = vector.broadcast %3 : vector<1x128xf32> to vector<32x128xf32>
    %5 = arith.addf %2, %4 : vector<32x128xf32>
    %cst_5 = arith.constant 0.00999999977 : f32
    %6 = vector.broadcast %cst_5 : f32 to vector<32x128xf32>
    %7 = arith.mulf %6, %5 : vector<32x128xf32>
    %8 = arith.maximumf %5, %7 : vector<32x128xf32>
    %c0_6 = arith.constant 0 : index
    %c0_7 = arith.constant 0 : index
    %9 = vector.load %arg4[%c0_6, %c0_7] : memref<128x128xf32, #tpu.memory_space<vmem>>, vector<128x128xf32>
    %cst_8 = arith.constant dense<0.000000e+00> : vector<32x128xf32>
    %10 = tpu.matmul %8, %9, %cst_8 {dimension_numbers = #tpu.dot_dimension_numbers<[1], [0], [0], [1], [0, 0, 1, 1], [], []>} : vector<32x128xf32>, vector<128x128xf32>, vector<32x128xf32> -> vector<32x128xf32>
    %c0_9 = arith.constant 0 : index
    %c0_10 = arith.constant 0 : index
    %11 = vector.load %arg5[%c0_9, %c0_10] : memref<1x128xf32, #tpu.memory_space<vmem>>, vector<1x128xf32>
    %12 = vector.broadcast %11 : vector<1x128xf32> to vector<32x128xf32>
    %13 = arith.addf %10, %12 : vector<32x128xf32>
    %cst_11 = arith.constant 0.00999999977 : f32
    %14 = vector.broadcast %cst_11 : f32 to vector<32x128xf32>
    %15 = arith.mulf %14, %13 : vector<32x128xf32>
    %16 = arith.maximumf %13, %15 : vector<32x128xf32>
    %c0_12 = arith.constant 0 : index
    %c0_13 = arith.constant 0 : index
    %17 = vector.load %arg1[%c0_12, %c0_13] : memref<32x128xf32, #tpu.memory_space<vmem>>, vector<32x128xf32>
    %18 = arith.addf %16, %17 : vector<32x128xf32>
    %c0_14 = arith.constant 0 : index
    %c0_15 = arith.constant 0 : index
    %19 = vector.load %arg6[%c0_14, %c0_15] : memref<32x128xf32, #tpu.memory_space<vmem>>, vector<32x128xf32>
    tpu.vector_store %arg6[%c0_14, %c0_15], %18 {strides = array<i32>} : memref<32x128xf32, #tpu.memory_space<vmem>>, vector<32x128xf32>,
    return
  }
  func.func @transform_0(%arg0: i32) -> (i32, i32) {
    %c0_i32 = arith.constant 0 : i32
    %c0_i32_0 = arith.constant 0 : i32
    return %arg0, %c0_i32 : i32, i32
  }
  func.func @transform_1(%arg0: i32) -> (i32, i32) {
    %c0_i32 = arith.constant 0 : i32
    %c0_i32_0 = arith.constant 0 : i32
    %c0_i32_1 = arith.constant 0 : i32
    return %c0_i32, %c0_i32_0 : i32, i32
  }
  func.func @transform_2(%arg0: i32) -> (i32, i32) {
    %c0_i32 = arith.constant 0 : i32
    %c0_i32_0 = arith.constant 0 : i32
    %c0_i32_1 = arith.constant 0 : i32
    return %c0_i32, %c0_i32_0 : i32, i32
  }
  func.func @transform_3(%arg0: i32) -> (i32, i32) {
    %c0_i32 = arith.constant 0 : i32
    %c0_i32_0 = arith.constant 0 : i32
    %c0_i32_1 = arith.constant 0 : i32
    return %c0_i32, %c0_i32_0 : i32, i32
  }
  func.func @transform_4(%arg0: i32) -> (i32, i32) {
    %c0_i32 = arith.constant 0 : i32
    %c0_i32_0 = arith.constant 0 : i32
    %c0_i32_1 = arith.constant 0 : i32
    return %c0_i32, %c0_i32_0 : i32, i32
  }
  func.func @transform_5(%arg0: i32) -> (i32, i32) {
    %c0_i32 = arith.constant 0 : i32
    %c0_i32_0 = arith.constant 0 : i32
    return %arg0, %c0_i32 : i32, i32
  }
}

</mosaic_0001>

<bundles_post_ra>
// kernel: tpu_custom_call.1
= control target key start
LH: loop header
LB: loop body
LE: loop exit
PB: predicated region body
PF: predicated region fallthrough
CT: control target
= control target key end

     0   :  { %10 = vsyncpa [#allocation3], 0  ;;  %s1360_s0 = inlined_call_operand.hbm [shape: f32[64,128], index: 0, kind: input, shape index: {}]   ;;  %s1361_s1 = inlined_call_operand.hbm [shape: f32[128,128], index: 1, kind: input, shape index: {}]   ;;  %s1362_s2 = inlined_call_operand.vmem [shape: f32[1,128], index: 2, kind: input, shape index: {}]   ;;  %s1363_s3 = inlined_call_operand.hbm [shape: f32[128,128], index: 3, kind: input, shape index: {}]   ;;  %s1364_s4 = inlined_call_operand.vmem [shape: f32[1,128], index: 4, kind: input, shape index: {}]   ;;  %s1365_s5 = inlined_call_operand.hbm [shape: f32[64,128], index: 5, kind: output, shape index: {}]  }
   0x1   :  { %12 = vsyncpa [#allocation3 + $0x1], 0 }
   0x2   :  { %13 = vsyncpa [#allocation6], 0 }
   0x3   :  { %14 = vsyncpa [#allocation4], 0 }
   0x4   :  { %16 = vsyncpa [#allocation4 + $0x1], 0  ;;  %s1093_s18 = smov 0   ;;  %s1095_s19 = smov 0  }
   0x5   :  { %s1097_s20 = smov 0   ;;  %s1099_s21 = smov 0  }
   0x6 LB: > { %s1114_s22 = sadd.s32 4294967295, %s1053_s21   ;;  %s624_s23 = sadd.s32 4294967294, %s1053_s21   ;;  %s1053_s21 = sphi %s1099_s21, %s1385_s21   ;;  %s1049_s20 = sphi %s1097_s20, %s1384_s20   ;;  %s1045_s19 = sphi %s1095_s19, %s1383_s19   ;;  %s1041_s18 = sphi %s1093_s18, %s1382_s18  }
   0x7   : > { %p42_p0 = scmp.ne.s32.totalorder %s1045_s19, %s1041_s18  ;;  %p1366_p1 = scmp.eq.s32.totalorder %s1114_s22, 0 }
   0x8   : > { %p156_p3 = scmp.eq.s32.totalorder %s624_s23, 1  ;;  %p625_p5 = scmp.ge.s32.totalorder %s1053_s21, 1 }
   0x9   : > { %p1123_p4 = por %p1366_p1, %p42_p0  ;;  %p163_p7 = scmp.lt.s32.totalorder %s1053_s21, 3 }
   0xa   : > { %p1128_p6 = por %p156_p3, %p42_p0  ;;  %s1055_s27 = smov [#allocation5]  }
   0xb   : > { %s1369_s24 = scalar_select %p1123_p4, 1, 0 }
   0xc   : > { %s1370_s25 = scalar_select %p1128_p6, 1, 0 }
   0xd   : > { %p1133_p8 = pnand %p625_p5, %p163_p7  ;;  %s175_s28 = sshll.u32 %s1055_s27, 4  ;;  %s1137_s28 = int_to_ptr.vmem [resolvable:$true] %s175_s28 }
   0xe   : > { %s1056_s30 = smov [#allocation7]   ;;  %s897_s9 = scalar_lea.hbm %s1361_s1, 2048 }
   0xf   : > { %p838_p9 = pneg %p1133_p8  ;;  %s191_s6 = sshll.u32 %s1056_s30, 4  ;;  %s1148_s6 = int_to_ptr.vmem [resolvable:$true] %s191_s6 }
  0x10   : > { %p898_p12 = scmp.ne.s32.totalorder %s1361_s1, %s897_s9  ;;  %p904_p5 = scmp.lt.u32.totalorder %s897_s9, %s1361_s1 }
  0x11   : > { %p1144_p11 = pnand %p838_p9, %p1366_p1 }
  0x13   : > { %p899_p13 = pneg %p1144_p11 }
  0x15   : > { %p900_p0 = pnand %p899_p13, %p898_p12 }
  0x17   : > { %p901_p3 = pneg %p900_p0 }
  0x19   : > { %p906_p7 = pnand %p904_p5, %p901_p3 }
  0x1b   : > { %909 = shalt.err (!%p906_p7)
}
  0x1c   : > { %s910_s14 = scalar_lea.vmem %s1137_s28, 2048  ;;  %p918_p2 = scmp.lt.s32.totalorder %s1137_s28, %s1137_s28 }
  0x1d   : > { %p911_p9 = scmp.ne.s32.totalorder %s1137_s28, %s910_s14  ;;  %p919_p12 = scmp.lt.s32.totalorder %s910_s14, %s910_s14 }
  0x1f   : > { %p913_p10 = pnand %p911_p9, %p899_p13  ;;  %p920_p0 = por %p919_p12, %p918_p2 }
  0x21   : > { %p914_p1 = pneg %p913_p10 }
  0x23   : > { %p921_p6 = pnand %p920_p0, %p914_p1 }
  0x25   : > { %924 = shalt.err (!%p921_p6)
}
  0x26   : > { %s1057_s15 = smov 128   ;;  %s1058_s16 = smov 8  }
  0x27   : > { %841 = dma.hbm_to_vmem [thread:$0]  (!%p1144_p11), %s1361_s1, 2048, %s1137_s28, [#allocation6], %s1057_s15, %s1057_s15, %s1058_s16  }
  0x28   : > { %s925_s7 = scalar_lea.hbm %s1363_s3, 2048 }
  0x29   : > { %p926_p1 = scmp.ne.s32.totalorder %s1363_s3, %s925_s7  ;;  %p932_p10 = scmp.lt.u32.totalorder %s925_s7, %s1363_s3 }
  0x2b   : > { %p928_p2 = pnand %p926_p1, %p899_p13 }
  0x2d   : > { %p929_p6 = pneg %p928_p2 }
  0x2f   : > { %p934_p3 = pnand %p932_p10, %p929_p6 }
  0x31   : > { %937 = shalt.err (!%p934_p3)
}
  0x32   : > { %s938_s28 = scalar_lea.vmem %s1148_s6, 2048  ;;  %p946_p12 = scmp.lt.s32.totalorder %s1148_s6, %s1148_s6 }
  0x33   : > { %p939_p5 = scmp.ne.s32.totalorder %s1148_s6, %s938_s28  ;;  %p947_p0 = scmp.lt.s32.totalorder %s938_s28, %s938_s28 }
  0x35   : > { %p941_p7 = pnand %p939_p5, %p899_p13  ;;  %p948_p1 = por %p947_p0, %p946_p12 }
  0x37   : > { %p942_p9 = pneg %p941_p7 }
  0x39   : > { %p949_p2 = pnand %p948_p1, %p942_p9 }
  0x3b   : > { %952 = shalt.err (!%p949_p2)
}
  0x3c   : > { %844 = dma.hbm_to_vmem [thread:$0]  (!%p1144_p11), %s1363_s3, 2048, %s1148_s6, [#allocation6], %s1057_s15, %s1057_s15, %s1058_s16  }
  0x3d   : > { %s1209_s29 = sadd.s32 1, %s1053_s21   ;;  %s29_s14 = sadd.s32 1, %s1049_s20 }
  0x3e   : > { %s26_s17 = ssub.s32 %s1053_s21, %s1209_s29  ;;  %p36_p13 = scmp.ne.s32.totalorder %s1049_s20, %s1045_s19 }
  0x3f   : > { %p27_p6 = scmp.eq.s32.totalorder %s26_s17, 0  ;;  %p37_p10 = scmp.eq.s32.totalorder %s1053_s21, 0 }
  0x40   : > { %p1373_p3 = scmp.eq.s32.totalorder %s1114_s22, 1  ;;  %p855_p7 = scmp.lt.s32.totalorder %s1053_s21, 2 }
  0x41   : > { %s1225_s27 = scalar_select %p27_p6, %s1049_s20, %s29_s14  }
  0x42   : > { %p1219_p5 = por %p1373_p3, %p36_p13  ;;  %p38_p9 = por %p37_p10, %p36_p13 }
  0x43   : > { %s208_s30 = sand.u32 1, %s1049_s20   ;;  %s644_s6 = sshll.u32 %s1053_s21, 9 }
  0x44   : > { %s1374_s23 = scalar_select %p1219_p5, 1, 0 }
  0x45   : > { %s629_s7 = sshll.u32 %s208_s30, 5  ;;  %s1232_s10 = scalar_lea.hbm %s1360_s0, %s644_s6 }
  0x46   : > { %s212_s11 = scalar_lea.vmem [#allocation2], %s629_s7  ;;  %p1236_p11 = pnand %p855_p7, %p38_p9 }
  0x47   : > { %s219_s28 = sshll.u32 %s212_s11, 4  ;;  %s1240_s13 = scalar_lea.sflag [#allocation3], %s208_s30  ;;  %s1234_s28 = int_to_ptr.vmem [resolvable:$true] %s219_s28 }
  0x48   : > { %s953_s14 = scalar_lea.hbm %s1232_s10, 512  ;;  %p955_p0 = pneg %p1236_p11 }
  0x49   : > { %p954_p12 = scmp.ne.s32.totalorder %s1232_s10, %s953_s14  ;;  %s958_s6 = scalar_lea.hbm %s1360_s0, 1024 }
  0x4a   : > { %p959_p13 = scmp.lt.u32.totalorder %s1232_s10, %s1360_s0  ;;  %p960_p6 = scmp.lt.u32.totalorder %s958_s6, %s953_s14 }
  0x4b   : > { %p956_p1 = pnand %p955_p0, %p954_p12  ;;  %p962_p3 = scmp.lt.u32.totalorder %s953_s14, %s1232_s10 }
  0x4c   : > { %p961_p10 = por %p960_p6, %p959_p13 }
  0x4d   : > { %p957_p2 = pneg %p956_p1 }
  0x4e   : > { %p963_p7 = por %p962_p3, %p961_p10 }
  0x50   : > { %p964_p9 = pnand %p963_p7, %p957_p2 }
  0x52   : > { %967 = shalt.err (!%p964_p9)
}
  0x53   : > { %s968_s30 = scalar_lea.vmem %s1234_s28, 512  ;;  %s1059_s11 = smov [#allocation2]  }
  0x54   : > { %p969_p12 = scmp.ne.s32.totalorder %s1234_s28, %s968_s30  ;;  %s973_s17 = sshll.u32 %s1059_s11, 4  ;;  %s974_s17 = int_to_ptr.vmem [resolvable:$false] %s973_s17 }
  0x55   : > { %s975_s7 = scalar_lea.vmem %s974_s17, 1024  ;;  %p976_p4 = scmp.lt.s32.totalorder %s1234_s28, %s974_s17 }
  0x56   : > { %p971_p1 = pnand %p969_p12, %p955_p0  ;;  %p977_p13 = scmp.lt.s32.totalorder %s975_s7, %s968_s30 }
  0x58   : > { %p972_p5 = pneg %p971_p1  ;;  %p978_p6 = por %p977_p13, %p976_p4 }
  0x5a   : > { %p979_p10 = pnand %p978_p6, %p972_p5 }
  0x5c   : > { %982 = shalt.err (!%p979_p10)
}
  0x5d   : > { %848 = dma.hbm_to_vmem [thread:$0]  (!%p1236_p11), %s1232_s10, 512, %s1234_s28, %s1240_s13, %s1057_s15, %s1057_s15, %s1058_s16  }
  0x5e   : > { %231 = sbr.rel (%p1133_p8) target bundleno = 600 (0x258), region = 40  ;;  %s1274_s14 = sand.u32 (!%p1133_p8), 1, %s1045_s19  }
  0x5f   : > { %s633_s6 = sshll.u32 (!%p1133_p8), %s1274_s14, 5  ;;  %s234_s8 = scalar_lea.sflag (!%p1133_p8), [#allocation3], %s1274_s14 }
  0x60   : > { %s1280_s12 = scalar_lea.vmem (!%p1133_p8), [#allocation2], %s633_s6  ;;  %p1376_p4 = scmp.ne.s32.totalorder (!%p1133_p8), %s1369_s24, 0 }
  0x65   : > { %1028 = dma.done.wait (%p1376_p4), %s234_s8, 512  }
  0x66   : > { %1030 = vsyncadd (%p1376_p4), %s234_s8, 4294966784  ;;  %p1377_p5 = scmp.eq.s32.totalorder %s1114_s22, 0 }
  0x68   : > { %1032 = dma.done.wait (%p1377_p5), [#allocation6], 4096   ;;  %p1378_p8 = pmov %p1377_p5 }
  0x69   : > { %v278_v0 = vld [vmem:[#allocation5] sm:$0xff]  ;;  %v279_v1 = vld [vmem:[#allocation5 + $0x8] sm:$0xff]  ;;  %v280_v2 = vld [vmem:[#allocation5 + $0x10] sm:$0xff]  ;;  %s271_s10 = scalar_lea.vmem [#allocation8], %s633_s6  ;;  %s645_s13 = sshll.u32 %s1114_s22, 9 }
  0x6a   : > { %1034 = vsyncadd (%p1378_p8), [#allocation6], 4294963200  ;;  %v762_v3 = vpack.c.bf16 %v279_v1, %v278_v0  ;;  %v281_v4 = vld [vmem:[#allocation5 + $0x18] sm:$0xff]  ;;  %v282_v6 = vld [vmem:[#allocation5 + $0x20] sm:$0xff]  ;;  %s532_s28 = sshll.u32 %s271_s10, 4  ;;  %s1315_s11 = scalar_lea.hbm %s1365_s5, %s645_s13  ;;  %s1310_s28 = int_to_ptr.vmem [resolvable:$true] %s532_s28 }
  0x6b   : > { %v766_v5 = vpack.c.bf16 %v281_v4, %v280_v2  ;;  %v283_v7 = vld [vmem:[#allocation5 + $0x28] sm:$0xff]  ;;  %v1291_v9 = vld [vmem:[%s1280_s12] sm:$0xff]  ;;  %v284_v10 = vld [vmem:[#allocation5 + $0x30] sm:$0xff]  ;;  %s519_s22 = scalar_lea.sflag [#allocation4], %s1274_s14  ;;  %s983_s17 = scalar_lea.vmem %s1310_s28, 512 }
  0x6c   : > { %763 = vmatprep.subr.bf16.mxu0 %v762_v3  ;;  %v770_v8 = vpack.c.bf16 %v283_v7, %v282_v6  ;;  %v285_v11 = vld [vmem:[#allocation5 + $0x38] sm:$0xff]  ;;  %718 = vmatprep.mubr.f32.mxu0 %v1291_v9  ;;  %v394_v12 = vld [vmem:[#allocation7] sm:$0xff]  ;;  %v395_v13 = vld [vmem:[#allocation7 + $0x8] sm:$0xff]  ;;  %p984_p11 = scmp.ne.s32.totalorder %s1310_s28, %s983_s17  ;;  %p1379_p0 = scmp.ne.s32.totalorder %s1374_s23, 0 }
  0x6d   : > { %765 = vmatpush3.bf16.msra.mxu0 %v762_v3  ;;  %v396_v14 = vld [vmem:[#allocation7 + $0x10] sm:$0xff]  ;;  %v397_v15 = vld [vmem:[#allocation7 + $0x18] sm:$0xff]  ;;  %v794_v16 = vpack.c.bf16 %v395_v13, %v394_v12  ;;  %v774_v18 = vpack.c.bf16 %v285_v11, %v284_v10  ;;  %v398_v19 = vld [vmem:[#allocation7 + $0x20] sm:$0xff]  ;;  %s1060_s7 = smov [#allocation8]  }
  0x6e   : > { %767 = vmatprep.subr.bf16.mxu0 %v766_v5  ;;  %v798_v17 = vpack.c.bf16 %v397_v15, %v396_v14  ;;  %v399_v20 = vld [vmem:[#allocation7 + $0x28] sm:$0xff]  ;;  %v286_v21 = vld [vmem:[#allocation5 + $0x40] sm:$0xff]  ;;  %v400_v25 = vld [vmem:[#allocation7 + $0x30] sm:$0xff]  ;;  %p985_p2 = pnand %p984_p11, %p1379_p0  ;;  %s987_s6 = sshll.u32 %s1060_s7, 4  ;;  %s988_s6 = int_to_ptr.vmem [resolvable:$false] %s987_s6 }
  0x6f   : > { %v287_v22 = vld [vmem:[#allocation5 + $0x48] sm:$0xff]  ;;  %795 = vmatprep.subr.bf16.mxu1 %v794_v16  ;;  %v802_v23 = vpack.c.bf16 %v399_v20, %v398_v19  ;;  %v401_v26 = vld [vmem:[#allocation7 + $0x38] sm:$0xff]  ;;  %v288_v27 = vld [vmem:[#allocation5 + $0x50] sm:$0xff]  ;;  %s989_s8 = scalar_lea.vmem %s988_s6, 1024  ;;  %p990_p7 = scmp.lt.s32.totalorder %s1310_s28, %s988_s6 }
  0x70   : > { %797 = vmatpush3.bf16.msra.mxu1 %v794_v16  ;;  %v778_v24 = vpack.c.bf16 %v287_v22, %v286_v21  ;;  %v289_v28 = vld [vmem:[#allocation5 + $0x58] sm:$0xff]  ;;  %v806_v29 = vpack.c.bf16 %v401_v26, %v400_v25  ;;  %v402_v31 = vld [vmem:[#allocation7 + $0x40] sm:$0xff]  ;;  %v403_v32 = vld [vmem:[#allocation7 + $0x48] sm:$0xff]  ;;  %p986_p3 = pneg %p985_p2  ;;  %p991_p9 = scmp.lt.s32.totalorder %s989_s8, %s983_s17 }
  0x71   : > { %769 = vmatpush3.bf16.msra.mxu0 %v766_v5  ;;  %799 = vmatprep.subr.bf16.mxu1 %v798_v17  ;;  %v782_v30 = vpack.c.bf16 %v289_v28, %v288_v27  ;;  %v290_v33 = vld [vmem:[#allocation5 + $0x60] sm:$0xff]  ;;  %v291_v34 = vld [vmem:[#allocation5 + $0x68] sm:$0xff]  ;;  %v810_v35 = vpack.c.bf16 %v403_v32, %v402_v31  ;;  %v404_v37 = vld [vmem:[#allocation7 + $0x50] sm:$0xff] }
  0x72   : > { %771 = vmatprep.subr.bf16.mxu0 %v770_v8  ;;  %v786_v36 = vpack.c.bf16 %v291_v34, %v290_v33  ;;  %v405_v38 = vld [vmem:[#allocation7 + $0x58] sm:$0xff]  ;;  %v292_v39 = vld [vmem:[#allocation5 + $0x70] sm:$0xff]  ;;  %v275_v43 = vld [vmem:[%s1280_s12 + $0x8] sm:$0xff]  ;;  %p992_p12 = por %p991_p9, %p990_p7 }
  0x73   : > { %v293_v40 = vld [vmem:[#allocation5 + $0x78] sm:$0xff]  ;;  %v814_v41 = vpack.c.bf16 %v405_v38, %v404_v37  ;;  %v1296_v44 = vld [vmem:[%s1280_s12 + $0x10] sm:$0xff]  ;;  %v406_v46 = vld [vmem:[#allocation7 + $0x60] sm:$0xff] }
  0x74   : > { %801 = vmatpush3.bf16.msra.mxu1 %v798_v17  ;;  %v790_v42 = vpack.c.bf16 %v293_v40, %v292_v39  ;;  %v277_v45 = vld [vmem:[%s1280_s12 + $0x18] sm:$0xff]  ;;  %v407_v47 = vld [vmem:[#allocation7 + $0x68] sm:$0xff]  ;;  %v408_v49 = vld [vmem:[#allocation7 + $0x70] sm:$0xff]  ;;  %p993_p1 = pnand %p992_p12, %p986_p3 }
  0x75   : > { %773 = vmatpush3.bf16.msra.mxu0 %v770_v8  ;;  %803 = vmatprep.subr.bf16.mxu1 %v802_v23  ;;  %v818_v48 = vpack.c.bf16 %v407_v47, %v406_v46  ;;  %v409_v50 = vld [vmem:[#allocation7 + $0x78] sm:$0xff]  ;;  %v637_v52 = vld [vmem:[%s1362_s2] ss:$0 sm:$0xff] }
  0x76   : > { %775 = vmatprep.subr.bf16.mxu0 %v774_v18  ;;  %v822_v51 = vpack.c.bf16 %v409_v50, %v408_v49  ;;  %v638_v5 = vld [vmem:[%s1364_s4] ss:$0 sm:$0xff] }
  0x78   : > { %805 = vmatpush3.bf16.msra.mxu1 %v802_v23 }
  0x79   : > { %777 = vmatpush3.bf16.msra.mxu0 %v774_v18  ;;  %807 = vmatprep.subr.bf16.mxu1 %v806_v29 }
  0x7a   : > { %779 = vmatprep.subr.bf16.mxu0 %v778_v24 }
  0x7c   : > { %809 = vmatpush3.bf16.msra.mxu1 %v806_v29 }
  0x7d   : > { %781 = vmatpush3.bf16.msra.mxu0 %v778_v24  ;;  %811 = vmatprep.subr.bf16.mxu1 %v810_v35 }
  0x7e   : > { %783 = vmatprep.subr.bf16.mxu0 %v782_v30 }
  0x80   : > { %813 = vmatpush3.bf16.msra.mxu1 %v810_v35 }
  0x81   : > { %785 = vmatpush3.bf16.msra.mxu0 %v782_v30  ;;  %815 = vmatprep.subr.bf16.mxu1 %v814_v41 }
  0x82   : > { %787 = vmatprep.subr.bf16.mxu0 %v786_v36 }
  0x84   : > { %817 = vmatpush3.bf16.msra.mxu1 %v814_v41 }
  0x85   : > { %789 = vmatpush3.bf16.msra.mxu0 %v786_v36  ;;  %819 = vmatprep.subr.bf16.mxu1 %v818_v48 }
  0x86   : > { %791 = vmatprep.subr.bf16.mxu0 %v790_v42 }
  0x88   : > { %821 = vmatpush3.bf16.msra.mxu1 %v818_v48 }
  0x89   : > { %793 = vmatpush3.bf16.msra.mxu0 %v790_v42  ;;  %823 = vmatprep.subr.bf16.mxu1 %v822_v51 }
  0x8c   : > { %719 = vmatmul.mubr.f32.vlgmr.msra.gmra.mrb[0].mxu0 %v275_v43  ;;  %825 = vmatpush3.bf16.msra.mxu1 %v822_v51 }
  0x8d   : > { %721 = vmatprep.mubr.f32.mxu0 %v1296_v44 }
  0x90   : > { %722 = vmatmul.mubr.f32.gmra.mrb[2].mxu0 %v277_v45 }
 0x15f   : > { %v720_v53 = vpop.f32.mrb[0].mxu0 }
 0x160   : > { %v373_v54 = vadd.f32 %v720_v53, %v637_v52  ;;  %v367_v55 = vpop.f32.mrb[1].mxu0 }
 0x161   : > { %v368_v56 = vadd.f32 %v637_v52, %v367_v55 }
 0x162   : > { %v387_v57 = vmul.f32 0.01, %v373_v54 }
 0x163   : > { %v723_v58 = vpop.f32.mrb[2].mxu0  ;;  %v386_v59 = vmul.f32 0.01, %v368_v56 }
 0x164   : > { %v383_v60 = vadd.f32 %v723_v58, %v637_v52  ;;  %v377_v61 = vpop.f32.mrb[3].mxu0  ;;  %v391_v0 = vmax.f32 %v373_v54, %v387_v57 }
 0x165   : > { %v378_v62 = vadd.f32 %v637_v52, %v377_v61  ;;  %v390_v63 = vmax.f32 %v368_v56, %v386_v59 }
 0x166   : > { %v389_v1 = vmul.f32 0.01, %v383_v60 }
 0x167   : > { %v388_v2 = vmul.f32 0.01, %v378_v62  ;;  %756 = vmatprep.mubr.f32.mxu1 %v390_v63 }
 0x168   : > { %757 = vmatmul.mubr.f32.vlgmr.msra.gmra.mrb[0].mxu1 %v391_v0  ;;  %v393_v4 = vmax.f32 %v383_v60, %v389_v1 }
 0x169   : > { %v392_v3 = vmax.f32 %v378_v62, %v388_v2 }
 0x16b   : > { %759 = vmatprep.mubr.f32.mxu1 %v392_v3 }
 0x16c   : > { %760 = vmatmul.mubr.f32.gmra.mrb[2].mxu1 %v393_v4 }
 0x23b   : > { %v758_v6 = vpop.f32.mrb[0].mxu1 }
 0x23c   : > { %v489_v7 = vadd.f32 %v758_v6, %v638_v5  ;;  %v483_v8 = vpop.f32.mrb[1].mxu1 }
 0x23d   : > { %v484_v10 = vadd.f32 %v638_v5, %v483_v8 }
 0x23e   : > { %v503_v11 = vmul.f32 0.01, %v489_v7 }
 0x23f   : > { %v502_v12 = vmul.f32 0.01, %v484_v10  ;;  %v761_v13 = vpop.f32.mrb[2].mxu1 }
 0x240   : > { %v507_v14 = vmax.f32 %v489_v7, %v503_v11  ;;  %v499_v15 = vadd.f32 %v761_v13, %v638_v5  ;;  %v493_v16 = vpop.f32.mrb[3].mxu1 }
 0x241   : > { %v506_v17 = vmax.f32 %v484_v10, %v502_v12  ;;  %v494_v18 = vadd.f32 %v638_v5, %v493_v16 }
 0x242   : > { %v511_v19 = vadd.f32 %v507_v14, %v275_v43  ;;  %v505_v20 = vmul.f32 0.01, %v499_v15 }
 0x243   : > { %v510_v21 = vadd.f32 %v506_v17, %v1291_v9  ;;  %v504_v22 = vmul.f32 0.01, %v494_v18 }
 0x244   : > { %515 = vst [vmem:[%s271_s10 + $0x8] sm:$0xff] %v511_v19  ;;  %v509_v23 = vmax.f32 %v499_v15, %v505_v20 }
 0x245   : > { %514 = vst [vmem:[%s271_s10] sm:$0xff] %v510_v21  ;;  %v508_v24 = vmax.f32 %v494_v18, %v504_v22 }
 0x246   : > { %v513_v25 = vadd.f32 %v509_v23, %v277_v45 }
 0x247   : > { %v512_v9 = vadd.f32 %v508_v24, %v1296_v44 }
 0x248   : > { %517 = vst [vmem:[%s271_s10 + $0x18] sm:$0xff] %v513_v25 }
 0x249   : > { %516 = vst [vmem:[%s271_s10 + $0x10] sm:$0xff] %v512_v9 }
 0x24a   : > { %996 = shalt.err (!%p993_p1)
}
 0x24b   : > { %s997_s12 = scalar_lea.hbm %s1315_s11, 512  ;;  %s1001_s15 = scalar_lea.hbm %s1365_s5, 1024 }
 0x24c   : > { %p998_p13 = scmp.ne.s32.totalorder %s1315_s11, %s997_s12  ;;  %p1002_p4 = scmp.lt.u32.totalorder %s1315_s11, %s1365_s5 }
 0x24d   : > { %p1003_p5 = scmp.lt.u32.totalorder %s1001_s15, %s997_s12  ;;  %p1005_p11 = scmp.lt.u32.totalorder %s997_s12, %s1315_s11 }
 0x24e   : > { %p999_p6 = pnand %p998_p13, %p1379_p0 }
 0x24f   : > { %p1004_p8 = por %p1003_p5, %p1002_p4 }
 0x250   : > { %p1000_p10 = pneg %p999_p6 }
 0x251   : > { %p1006_p2 = por %p1005_p11, %p1004_p8 }
 0x253   : > { %p1007_p3 = pnand %p1006_p2, %p1000_p10 }
 0x255   : > { %1010 = shalt.err (!%p1007_p3)
}
 0x256   : > { %s1061_s13 = smov 128   ;;  %s1062_s9 = smov 8  }
 0x257   : > { %836 = dma.vmem_to_hbm [thread:$0]  (%p1379_p0), %s1310_s28, 512, %s1315_s11, %s519_s22, %s1061_s13, %s1061_s13, %s1062_s9  }
 0x258 PF: > { %s547_s30 = sand.u32 1, %s1041_s18   ;;  %p1380_p7 = scmp.ne.s32.totalorder %s1370_s25, 0 }
 0x259   : > { %p1381_p9 = scmp.ge.s32.totalorder %s1053_s21, 2  ;;  %s548_s17 = scalar_lea.sflag [#allocation4], %s547_s30 }
 0x25b   : > { %p850_p12 = pnand %p1381_p9, %p1380_p7 }
 0x25d   : > { %1036 = dma.done.wait (!%p850_p12), %s548_s17, 512  }
 0x25e   : > { %1038 = vsyncadd (!%p850_p12), %s548_s17, 4294966784  ;;  %p19_p1 = scmp.ge.s32.totalorder %s1209_s29, 4   ;;  %s1382_s18 = smov %s1045_s19 }
 0x25f   : > { %s1383_s19 = smov %s1049_s20  ;;  %s1384_s20 = smov %s1225_s27 }
 0x260   : > { %s1385_s21 = smov %s1209_s29  ;;  %21 = sbr.rel (!%p19_p1) target bundleno = 6 (0x6), region = 93 }
 0x267   :  { %553 = vsyncpa [#allocation3], 1 }
 0x268   :  { %555 = vsyncpa [#allocation3 + $0x1], 1 }
 0x269   :  { %556 = vsyncpa [#allocation6], 1 }
 0x26a   :  { %557 = vsyncpa [#allocation4], 1 }
 0x26b   :  { %559 = vsyncpa [#allocation4 + $0x1], 1 }

// kernel: tpu_custom_call.1
= control target key start
LH: loop header
LB: loop body
LE: loop exit
PB: predicated region body
PF: predicated region fallthrough
CT: control target
= control target key end

     0   :  { %10 = vsyncpa [#allocation3], 0  ;;  %s1360_s0 = inlined_call_operand.hbm [shape: f32[64,128], index: 0, kind: input, shape index: {}]   ;;  %s1361_s1 = inlined_call_operand.hbm [shape: f32[128,128], index: 1, kind: input, shape index: {}]   ;;  %s1362_s2 = inlined_call_operand.vmem [shape: f32[1,128], index: 2, kind: input, shape index: {}]   ;;  %s1363_s3 = inlined_call_operand.hbm [shape: f32[128,128], index: 3, kind: input, shape index: {}]   ;;  %s1364_s4 = inlined_call_operand.vmem [shape: f32[1,128], index: 4, kind: input, shape index: {}]   ;;  %s1365_s5 = inlined_call_operand.hbm [shape: f32[64,128], index: 5, kind: output, shape index: {}]  }
   0x1   :  { %12 = vsyncpa [#allocation3 + $0x1], 0 }
   0x2   :  { %13 = vsyncpa [#allocation6], 0 }
   0x3   :  { %14 = vsyncpa [#allocation4], 0 }
   0x4   :  { %16 = vsyncpa [#allocation4 + $0x1], 0  ;;  %s1093_s18 = smov 0   ;;  %s1095_s19 = smov 0  }
   0x5   :  { %s1097_s20 = smov 0   ;;  %s1099_s21 = smov 0  }
   0x6 LB: > { %s1114_s22 = sadd.s32 4294967295, %s1053_s21   ;;  %s624_s23 = sadd.s32 4294967294, %s1053_s21   ;;  %s1053_s21 = sphi %s1099_s21, %s1385_s21   ;;  %s1049_s20 = sphi %s1097_s20, %s1384_s20   ;;  %s1045_s19 = sphi %s1095_s19, %s1383_s19   ;;  %s1041_s18 = sphi %s1093_s18, %s1382_s18  }
   0x7   : > { %p42_p0 = scmp.ne.s32.totalorder %s1045_s19, %s1041_s18  ;;  %p1366_p1 = scmp.eq.s32.totalorder %s1114_s22, 0 }
   0x8   : > { %p156_p3 = scmp.eq.s32.totalorder %s624_s23, 1  ;;  %p625_p5 = scmp.ge.s32.totalorder %s1053_s21, 1 }
   0x9   : > { %p1123_p4 = por %p1366_p1, %p42_p0  ;;  %p163_p7 = scmp.lt.s32.totalorder %s1053_s21, 3 }
   0xa   : > { %p1128_p6 = por %p156_p3, %p42_p0  ;;  %s1055_s27 = smov [#allocation5]  }
   0xb   : > { %s1369_s24 = scalar_select %p1123_p4, 1, 0 }
   0xc   : > { %s1370_s25 = scalar_select %p1128_p6, 1, 0 }
   0xd   : > { %p1133_p8 = pnand %p625_p5, %p163_p7  ;;  %s175_s28 = sshll.u32 %s1055_s27, 4  ;;  %s1137_s28 = int_to_ptr.vmem [resolvable:$true] %s175_s28 }
   0xe   : > { %s1056_s30 = smov [#allocation7]   ;;  %s897_s9 = scalar_lea.hbm %s1361_s1, 2048 }
   0xf   : > { %p838_p9 = pneg %p1133_p8  ;;  %s191_s6 = sshll.u32 %s1056_s30, 4  ;;  %s1148_s6 = int_to_ptr.vmem [resolvable:$true] %s191_s6 }
  0x10   : > { %p898_p12 = scmp.ne.s32.totalorder %s1361_s1, %s897_s9  ;;  %p904_p5 = scmp.lt.u32.totalorder %s897_s9, %s1361_s1 }
  0x11   : > { %p1144_p11 = pnand %p838_p9, %p1366_p1 }
  0x13   : > { %p899_p13 = pneg %p1144_p11 }
  0x15   : > { %p900_p0 = pnand %p899_p13, %p898_p12 }
  0x17   : > { %p901_p3 = pneg %p900_p0 }
  0x19   : > { %p906_p7 = pnand %p904_p5, %p901_p3 }
  0x1b   : > { %909 = shalt.err (!%p906_p7)
}
  0x1c   : > { %s910_s14 = scalar_lea.vmem %s1137_s28, 2048  ;;  %p918_p2 = scmp.lt.s32.totalorder %s1137_s28, %s1137_s28 }
  0x1d   : > { %p911_p9 = scmp.ne.s32.totalorder %s1137_s28, %s910_s14  ;;  %p919_p12 = scmp.lt.s32.totalorder %s910_s14, %s910_s14 }
  0x1f   : > { %p913_p10 = pnand %p911_p9, %p899_p13  ;;  %p920_p0 = por %p919_p12, %p918_p2 }
  0x21   : > { %p914_p1 = pneg %p913_p10 }
  0x23   : > { %p921_p6 = pnand %p920_p0, %p914_p1 }
  0x25   : > { %924 = shalt.err (!%p921_p6)
}
  0x26   : > { %s1057_s15 = smov 128   ;;  %s1058_s16 = smov 8  }
  0x27   : > { %841 = dma.hbm_to_vmem [thread:$0]  (!%p1144_p11), %s1361_s1, 2048, %s1137_s28, [#allocation6], %s1057_s15, %s1057_s15, %s1058_s16  }
  0x28   : > { %s925_s7 = scalar_lea.hbm %s1363_s3, 2048 }
  0x29   : > { %p926_p1 = scmp.ne.s32.totalorder %s1363_s3, %s925_s7  ;;  %p932_p10 = scmp.lt.u32.totalorder %s925_s7, %s1363_s3 }
  0x2b   : > { %p928_p2 = pnand %p926_p1, %p899_p13 }
  0x2d   : > { %p929_p6 = pneg %p928_p2 }
  0x2f   : > { %p934_p3 = pnand %p932_p10, %p929_p6 }
  0x31   : > { %937 = shalt.err (!%p934_p3)
}
  0x32   : > { %s938_s28 = scalar_lea.vmem %s1148_s6, 2048  ;;  %p946_p12 = scmp.lt.s32.totalorder %s1148_s6, %s1148_s6 }
  0x33   : > { %p939_p5 = scmp.ne.s32.totalorder %s1148_s6, %s938_s28  ;;  %p947_p0 = scmp.lt.s32.totalorder %s938_s28, %s938_s28 }
  0x35   : > { %p941_p7 = pnand %p939_p5, %p899_p13  ;;  %p948_p1 = por %p947_p0, %p946_p12 }
  0x37   : > { %p942_p9 = pneg %p941_p7 }
  0x39   : > { %p949_p2 = pnand %p948_p1, %p942_p9 }
  0x3b   : > { %952 = shalt.err (!%p949_p2)
}
  0x3c   : > { %844 = dma.hbm_to_vmem [thread:$0]  (!%p1144_p11), %s1363_s3, 2048, %s1148_s6, [#allocation6], %s1057_s15, %s1057_s15, %s1058_s16  }
  0x3d   : > { %s1209_s29 = sadd.s32 1, %s1053_s21   ;;  %s29_s14 = sadd.s32 1, %s1049_s20 }
  0x3e   : > { %s26_s17 = ssub.s32 %s1053_s21, %s1209_s29  ;;  %p36_p13 = scmp.ne.s32.totalorder %s1049_s20, %s1045_s19 }
  0x3f   : > { %p27_p6 = scmp.eq.s32.totalorder %s26_s17, 0  ;;  %p37_p10 = scmp.eq.s32.totalorder %s1053_s21, 0 }
  0x40   : > { %p1373_p3 = scmp.eq.s32.totalorder %s1114_s22, 1  ;;  %p855_p7 = scmp.lt.s32.totalorder %s1053_s21, 2 }
  0x41   : > { %s1225_s27 = scalar_select %p27_p6, %s1049_s20, %s29_s14  }
  0x42   : > { %p1219_p5 = por %p1373_p3, %p36_p13  ;;  %p38_p9 = por %p37_p10, %p36_p13 }
  0x43   : > { %s208_s30 = sand.u32 1, %s1049_s20   ;;  %s644_s6 = sshll.u32 %s1053_s21, 9 }
  0x44   : > { %s1374_s23 = scalar_select %p1219_p5, 1, 0 }
  0x45   : > { %s629_s7 = sshll.u32 %s208_s30, 5  ;;  %s1232_s10 = scalar_lea.hbm %s1360_s0, %s644_s6 }
  0x46   : > { %s212_s11 = scalar_lea.vmem [#allocation2], %s629_s7  ;;  %p1236_p11 = pnand %p855_p7, %p38_p9 }
  0x47   : > { %s219_s28 = sshll.u32 %s212_s11, 4  ;;  %s1240_s13 = scalar_lea.sflag [#allocation3], %s208_s30  ;;  %s1234_s28 = int_to_ptr.vmem [resolvable:$true] %s219_s28 }
  0x48   : > { %s953_s14 = scalar_lea.hbm %s1232_s10, 512  ;;  %p955_p0 = pneg %p1236_p11 }
  0x49   : > { %p954_p12 = scmp.ne.s32.totalorder %s1232_s10, %s953_s14  ;;  %s958_s6 = scalar_lea.hbm %s1360_s0, 1024 }
  0x4a   : > { %p959_p13 = scmp.lt.u32.totalorder %s1232_s10, %s1360_s0  ;;  %p960_p6 = scmp.lt.u32.totalorder %s958_s6, %s953_s14 }
  0x4b   : > { %p956_p1 = pnand %p955_p0, %p954_p12  ;;  %p962_p3 = scmp.lt.u32.totalorder %s953_s14, %s1232_s10 }
  0x4c   : > { %p961_p10 = por %p960_p6, %p959_p13 }
  0x4d   : > { %p957_p2 = pneg %p956_p1 }
  0x4e   : > { %p963_p7 = por %p962_p3, %p961_p10 }
  0x50   : > { %p964_p9 = pnand %p963_p7, %p957_p2 }
  0x52   : > { %967 = shalt.err (!%p964_p9)
}
  0x53   : > { %s968_s30 = scalar_lea.vmem %s1234_s28, 512  ;;  %s1059_s11 = smov [#allocation2]  }
  0x54   : > { %p969_p12 = scmp.ne.s32.totalorder %s1234_s28, %s968_s30  ;;  %s973_s17 = sshll.u32 %s1059_s11, 4  ;;  %s974_s17 = int_to_ptr.vmem [resolvable:$false] %s973_s17 }
  0x55   : > { %s975_s7 = scalar_lea.vmem %s974_s17, 1024  ;;  %p976_p4 = scmp.lt.s32.totalorder %s1234_s28, %s974_s17 }
  0x56   : > { %p971_p1 = pnand %p969_p12, %p955_p0  ;;  %p977_p13 = scmp.lt.s32.totalorder %s975_s7, %s968_s30 }
  0x58   : > { %p972_p5 = pneg %p971_p1  ;;  %p978_p6 = por %p977_p13, %p976_p4 }
  0x5a   : > { %p979_p10 = pnand %p978_p6, %p972_p5 }
  0x5c   : > { %982 = shalt.err (!%p979_p10)
}
  0x5d   : > { %848 = dma.hbm_to_vmem [thread:$0]  (!%p1236_p11), %s1232_s10, 512, %s1234_s28, %s1240_s13, %s1057_s15, %s1057_s15, %s1058_s16  }
  0x5e   : > { %231 = sbr.rel (%p1133_p8) target bundleno = 600 (0x258), region = 40  ;;  %s1274_s14 = sand.u32 (!%p1133_p8), 1, %s1045_s19  }
  0x5f   : > { %s633_s6 = sshll.u32 (!%p1133_p8), %s1274_s14, 5  ;;  %s234_s8 = scalar_lea.sflag (!%p1133_p8), [#allocation3], %s1274_s14 }
  0x60   : > { %s1280_s12 = scalar_lea.vmem (!%p1133_p8), [#allocation2], %s633_s6  ;;  %p1376_p4 = scmp.ne.s32.totalorder (!%p1133_p8), %s1369_s24, 0 }
  0x65   : > { %1028 = dma.done.wait (%p1376_p4), %s234_s8, 512  }
  0x66   : > { %1030 = vsyncadd (%p1376_p4), %s234_s8, 4294966784  ;;  %p1377_p5 = scmp.eq.s32.totalorder %s1114_s22, 0 }
  0x68   : > { %1032 = dma.done.wait (%p1377_p5), [#allocation6], 4096   ;;  %p1378_p8 = pmov %p1377_p5 }
  0x69   : > { %v278_v0 = vld [vmem:[#allocation5] sm:$0xff]  ;;  %v279_v1 = vld [vmem:[#allocation5 + $0x8] sm:$0xff]  ;;  %v280_v2 = vld [vmem:[#allocation5 + $0x10] sm:$0xff]  ;;  %s271_s10 = scalar_lea.vmem [#allocation8], %s633_s6  ;;  %s645_s13 = sshll.u32 %s1114_s22, 9 }
  0x6a   : > { %1034 = vsyncadd (%p1378_p8), [#allocation6], 4294963200  ;;  %v762_v3 = vpack.c.bf16 %v279_v1, %v278_v0  ;;  %v281_v4 = vld [vmem:[#allocation5 + $0x18] sm:$0xff]  ;;  %v282_v6 = vld [vmem:[#allocation5 + $0x20] sm:$0xff]  ;;  %s532_s28 = sshll.u32 %s271_s10, 4  ;;  %s1315_s11 = scalar_lea.hbm %s1365_s5, %s645_s13  ;;  %s1310_s28 = int_to_ptr.vmem [resolvable:$true] %s532_s28 }
  0x6b   : > { %v766_v5 = vpack.c.bf16 %v281_v4, %v280_v2  ;;  %v283_v7 = vld [vmem:[#allocation5 + $0x28] sm:$0xff]  ;;  %v1291_v9 = vld [vmem:[%s1280_s12] sm:$0xff]  ;;  %v284_v10 = vld [vmem:[#allocation5 + $0x30] sm:$0xff]  ;;  %s519_s22 = scalar_lea.sflag [#allocation4], %s1274_s14  ;;  %s983_s17 = scalar_lea.vmem %s1310_s28, 512 }
  0x6c   : > { %763 = vmatprep.subr.bf16.mxu0 %v762_v3  ;;  %v770_v8 = vpack.c.bf16 %v283_v7, %v282_v6  ;;  %v285_v11 = vld [vmem:[#allocation5 + $0x38] sm:$0xff]  ;;  %718 = vmatprep.mubr.f32.mxu0 %v1291_v9  ;;  %v394_v12 = vld [vmem:[#allocation7] sm:$0xff]  ;;  %v395_v13 = vld [vmem:[#allocation7 + $0x8] sm:$0xff]  ;;  %p984_p11 = scmp.ne.s32.totalorder %s1310_s28, %s983_s17  ;;  %p1379_p0 = scmp.ne.s32.totalorder %s1374_s23, 0 }
  0x6d   : > { %765 = vmatpush3.bf16.msra.mxu0 %v762_v3  ;;  %v396_v14 = vld [vmem:[#allocation7 + $0x10] sm:$0xff]  ;;  %v397_v15 = vld [vmem:[#allocation7 + $0x18] sm:$0xff]  ;;  %v794_v16 = vpack.c.bf16 %v395_v13, %v394_v12  ;;  %v774_v18 = vpack.c.bf16 %v285_v11, %v284_v10  ;;  %v398_v19 = vld [vmem:[#allocation7 + $0x20] sm:$0xff]  ;;  %s1060_s7 = smov [#allocation8]  }
  0x6e   : > { %767 = vmatprep.subr.bf16.mxu0 %v766_v5  ;;  %v798_v17 = vpack.c.bf16 %v397_v15, %v396_v14  ;;  %v399_v20 = vld [vmem:[#allocation7 + $0x28] sm:$0xff]  ;;  %v286_v21 = vld [vmem:[#allocation5 + $0x40] sm:$0xff]  ;;  %v400_v25 = vld [vmem:[#allocation7 + $0x30] sm:$0xff]  ;;  %p985_p2 = pnand %p984_p11, %p1379_p0  ;;  %s987_s6 = sshll.u32 %s1060_s7, 4  ;;  %s988_s6 = int_to_ptr.vmem [resolvable:$false] %s987_s6 }
  0x6f   : > { %v287_v22 = vld [vmem:[#allocation5 + $0x48] sm:$0xff]  ;;  %795 = vmatprep.subr.bf16.mxu1 %v794_v16  ;;  %v802_v23 = vpack.c.bf16 %v399_v20, %v398_v19  ;;  %v401_v26 = vld [vmem:[#allocation7 + $0x38] sm:$0xff]  ;;  %v288_v27 = vld [vmem:[#allocation5 + $0x50] sm:$0xff]  ;;  %s989_s8 = scalar_lea.vmem %s988_s6, 1024  ;;  %p990_p7 = scmp.lt.s32.totalorder %s1310_s28, %s988_s6 }
  0x70   : > { %797 = vmatpush3.bf16.msra.mxu1 %v794_v16  ;;  %v778_v24 = vpack.c.bf16 %v287_v22, %v286_v21  ;;  %v289_v28 = vld [vmem:[#allocation5 + $0x58] sm:$0xff]  ;;  %v806_v29 = vpack.c.bf16 %v401_v26, %v400_v25  ;;  %v402_v31 = vld [vmem:[#allocation7 + $0x40] sm:$0xff]  ;;  %v403_v32 = vld [vmem:[#allocation7 + $0x48] sm:$0xff]  ;;  %p986_p3 = pneg %p985_p2  ;;  %p991_p9 = scmp.lt.s32.totalorder %s989_s8, %s983_s17 }
  0x71   : > { %769 = vmatpush3.bf16.msra.mxu0 %v766_v5  ;;  %799 = vmatprep.subr.bf16.mxu1 %v798_v17  ;;  %v782_v30 = vpack.c.bf16 %v289_v28, %v288_v27  ;;  %v290_v33 = vld [vmem:[#allocation5 + $0x60] sm:$0xff]  ;;  %v291_v34 = vld [vmem:[#allocation5 + $0x68] sm:$0xff]  ;;  %v810_v35 = vpack.c.bf16 %v403_v32, %v402_v31  ;;  %v404_v37 = vld [vmem:[#allocation7 + $0x50] sm:$0xff] }
  0x72   : > { %771 = vmatprep.subr.bf16.mxu0 %v770_v8  ;;  %v786_v36 = vpack.c.bf16 %v291_v34, %v290_v33  ;;  %v405_v38 = vld [vmem:[#allocation7 + $0x58] sm:$0xff]  ;;  %v292_v39 = vld [vmem:[#allocation5 + $0x70] sm:$0xff]  ;;  %v275_v43 = vld [vmem:[%s1280_s12 + $0x8] sm:$0xff]  ;;  %p992_p12 = por %p991_p9, %p990_p7 }
  0x73   : > { %v293_v40 = vld [vmem:[#allocation5 + $0x78] sm:$0xff]  ;;  %v814_v41 = vpack.c.bf16 %v405_v38, %v404_v37  ;;  %v1296_v44 = vld [vmem:[%s1280_s12 + $0x10] sm:$0xff]  ;;  %v406_v46 = vld [vmem:[#allocation7 + $0x60] sm:$0xff] }
  0x74   : > { %801 = vmatpush3.bf16.msra.mxu1 %v798_v17  ;;  %v790_v42 = vpack.c.bf16 %v293_v40, %v292_v39  ;;  %v277_v45 = vld [vmem:[%s1280_s12 + $0x18] sm:$0xff]  ;;  %v407_v47 = vld [vmem:[#allocation7 + $0x68] sm:$0xff]  ;;  %v408_v49 = vld [vmem:[#allocation7 + $0x70] sm:$0xff]  ;;  %p993_p1 = pnand %p992_p12, %p986_p3 }
  0x75   : > { %773 = vmatpush3.bf16.msra.mxu0 %v770_v8  ;;  %803 = vmatprep.subr.bf16.mxu1 %v802_v23  ;;  %v818_v48 = vpack.c.bf16 %v407_v47, %v406_v46  ;;  %v409_v50 = vld [vmem:[#allocation7 + $0x78] sm:$0xff]  ;;  %v637_v52 = vld [vmem:[%s1362_s2] ss:$0 sm:$0xff] }
  0x76   : > { %775 = vmatprep.subr.bf16.mxu0 %v774_v18  ;;  %v822_v51 = vpack.c.bf16 %v409_v50, %v408_v49  ;;  %v638_v5 = vld [vmem:[%s1364_s4] ss:$0 sm:$0xff] }
  0x78   : > { %805 = vmatpush3.bf16.msra.mxu1 %v802_v23 }
  0x79   : > { %777 = vmatpush3.bf16.msra.mxu0 %v774_v18  ;;  %807 = vmatprep.subr.bf16.mxu1 %v806_v29 }
  0x7a   : > { %779 = vmatprep.subr.bf16.mxu0 %v778_v24 }
  0x7c   : > { %809 = vmatpush3.bf16.msra.mxu1 %v806_v29 }
  0x7d   : > { %781 = vmatpush3.bf16.msra.mxu0 %v778_v24  ;;  %811 = vmatprep.subr.bf16.mxu1 %v810_v35 }
  0x7e   : > { %783 = vmatprep.subr.bf16.mxu0 %v782_v30 }
  0x80   : > { %813 = vmatpush3.bf16.msra.mxu1 %v810_v35 }
  0x81   : > { %785 = vmatpush3.bf16.msra.mxu0 %v782_v30  ;;  %815 = vmatprep.subr.bf16.mxu1 %v814_v41 }
  0x82   : > { %787 = vmatprep.subr.bf16.mxu0 %v786_v36 }
  0x84   : > { %817 = vmatpush3.bf16.msra.mxu1 %v814_v41 }
  0x85   : > { %789 = vmatpush3.bf16.msra.mxu0 %v786_v36  ;;  %819 = vmatprep.subr.bf16.mxu1 %v818_v48 }
  0x86   : > { %791 = vmatprep.subr.bf16.mxu0 %v790_v42 }
  0x88   : > { %821 = vmatpush3.bf16.msra.mxu1 %v818_v48 }
  0x89   : > { %793 = vmatpush3.bf16.msra.mxu0 %v790_v42  ;;  %823 = vmatprep.subr.bf16.mxu1 %v822_v51 }
  0x8c   : > { %719 = vmatmul.mubr.f32.vlgmr.msra.gmra.mrb[0].mxu0 %v275_v43  ;;  %825 = vmatpush3.bf16.msra.mxu1 %v822_v51 }
  0x8d   : > { %721 = vmatprep.mubr.f32.mxu0 %v1296_v44 }
  0x90   : > { %722 = vmatmul.mubr.f32.gmra.mrb[2].mxu0 %v277_v45 }
 0x15f   : > { %v720_v53 = vpop.f32.mrb[0].mxu0 }
 0x160   : > { %v373_v54 = vadd.f32 %v720_v53, %v637_v52  ;;  %v367_v55 = vpop.f32.mrb[1].mxu0 }
 0x161   : > { %v368_v56 = vadd.f32 %v637_v52, %v367_v55 }
 0x162   : > { %v387_v57 = vmul.f32 0.01, %v373_v54 }
 0x163   : > { %v723_v58 = vpop.f32.mrb[2].mxu0  ;;  %v386_v59 = vmul.f32 0.01, %v368_v56 }
 0x164   : > { %v383_v60 = vadd.f32 %v723_v58, %v637_v52  ;;  %v377_v61 = vpop.f32.mrb[3].mxu0  ;;  %v391_v0 = vmax.f32 %v373_v54, %v387_v57 }
 0x165   : > { %v378_v62 = vadd.f32 %v637_v52, %v377_v61  ;;  %v390_v63 = vmax.f32 %v368_v56, %v386_v59 }
 0x166   : > { %v389_v1 = vmul.f32 0.01, %v383_v60 }
 0x167   : > { %v388_v2 = vmul.f32 0.01, %v378_v62  ;;  %756 = vmatprep.mubr.f32.mxu1 %v390_v63 }
 0x168   : > { %757 = vmatmul.mubr.f32.vlgmr.msra.gmra.mrb[0].mxu1 %v391_v0  ;;  %v393_v4 = vmax.f32 %v383_v60, %v389_v1 }
 0x169   : > { %v392_v3 = vmax.f32 %v378_v62, %v388_v2 }
 0x16b   : > { %759 = vmatprep.mubr.f32.mxu1 %v392_v3 }
 0x16c   : > { %760 = vmatmul.mubr.f32.gmra.mrb[2].mxu1 %v393_v4 }
 0x23b   : > { %v758_v6 = vpop.f32.mrb[0].mxu1 }
 0x23c   : > { %v489_v7 = vadd.f32 %v758_v6, %v638_v5  ;;  %v483_v8 = vpop.f32.mrb[1].mxu1 }
 0x23d   : > { %v484_v10 = vadd.f32 %v638_v5, %v483_v8 }
 0x23e   : > { %v503_v11 = vmul.f32 0.01, %v489_v7 }
 0x23f   : > { %v502_v12 = vmul.f32 0.01, %v484_v10  ;;  %v761_v13 = vpop.f32.mrb[2].mxu1 }
 0x240   : > { %v507_v14 = vmax.f32 %v489_v7, %v503_v11  ;;  %v499_v15 = vadd.f32 %v761_v13, %v638_v5  ;;  %v493_v16 = vpop.f32.mrb[3].mxu1 }
 0x241   : > { %v506_v17 = vmax.f32 %v484_v10, %v502_v12  ;;  %v494_v18 = vadd.f32 %v638_v5, %v493_v16 }
 0x242   : > { %v511_v19 = vadd.f32 %v507_v14, %v275_v43  ;;  %v505_v20 = vmul.f32 0.01, %v499_v15 }
 0x243   : > { %v510_v21 = vadd.f32 %v506_v17, %v1291_v9  ;;  %v504_v22 = vmul.f32 0.01, %v494_v18 }
 0x244   : > { %515 = vst [vmem:[%s271_s10 + $0x8] sm:$0xff] %v511_v19  ;;  %v509_v23 = vmax.f32 %v499_v15, %v505_v20 }
 0x245   : > { %514 = vst [vmem:[%s271_s10] sm:$0xff] %v510_v21  ;;  %v508_v24 = vmax.f32 %v494_v18, %v504_v22 }
 0x246   : > { %v513_v25 = vadd.f32 %v509_v23, %v277_v45 }
 0x247   : > { %v512_v9 = vadd.f32 %v508_v24, %v1296_v44 }
 0x248   : > { %517 = vst [vmem:[%s271_s10 + $0x18] sm:$0xff] %v513_v25 }
 0x249   : > { %516 = vst [vmem:[%s271_s10 + $0x10] sm:$0xff] %v512_v9 }
 0x24a   : > { %996 = shalt.err (!%p993_p1)
}
 0x24b   : > { %s997_s12 = scalar_lea.hbm %s1315_s11, 512  ;;  %s1001_s15 = scalar_lea.hbm %s1365_s5, 1024 }
 0x24c   : > { %p998_p13 = scmp.ne.s32.totalorder %s1315_s11, %s997_s12  ;;  %p1002_p4 = scmp.lt.u32.totalorder %s1315_s11, %s1365_s5 }
 0x24d   : > { %p1003_p5 = scmp.lt.u32.totalorder %s1001_s15, %s997_s12  ;;  %p1005_p11 = scmp.lt.u32.totalorder %s997_s12, %s1315_s11 }
 0x24e   : > { %p999_p6 = pnand %p998_p13, %p1379_p0 }
 0x24f   : > { %p1004_p8 = por %p1003_p5, %p1002_p4 }
 0x250   : > { %p1000_p10 = pneg %p999_p6 }
 0x251   : > { %p1006_p2 = por %p1005_p11, %p1004_p8 }
 0x253   : > { %p1007_p3 = pnand %p1006_p2, %p1000_p10 }
 0x255   : > { %1010 = shalt.err (!%p1007_p3)
}
 0x256   : > { %s1061_s13 = smov 128   ;;  %s1062_s9 = smov 8  }
 0x257   : > { %836 = dma.vmem_to_hbm [thread:$0]  (%p1379_p0), %s1310_s28, 512, %s1315_s11, %s519_s22, %s1061_s13, %s1061_s13, %s1062_s9  }
 0x258 PF: > { %s547_s30 = sand.u32 1, %s1041_s18   ;;  %p1380_p7 = scmp.ne.s32.totalorder %s1370_s25, 0 }
 0x259   : > { %p1381_p9 = scmp.ge.s32.totalorder %s1053_s21, 2  ;;  %s548_s17 = scalar_lea.sflag [#allocation4], %s547_s30 }
 0x25b   : > { %p850_p12 = pnand %p1381_p9, %p1380_p7 }
 0x25d   : > { %1036 = dma.done.wait (!%p850_p12), %s548_s17, 512  }
 0x25e   : > { %1038 = vsyncadd (!%p850_p12), %s548_s17, 4294966784  ;;  %p19_p1 = scmp.ge.s32.totalorder %s1209_s29, 4   ;;  %s1382_s18 = smov %s1045_s19 }
 0x25f   : > { %s1383_s19 = smov %s1049_s20  ;;  %s1384_s20 = smov %s1225_s27 }
 0x260   : > { %s1385_s21 = smov %s1209_s29  ;;  %21 = sbr.rel (!%p19_p1) target bundleno = 6 (0x6), region = 93 }
 0x267   :  { %553 = vsyncpa [#allocation3], 1 }
 0x268   :  { %555 = vsyncpa [#allocation3 + $0x1], 1 }
 0x269   :  { %556 = vsyncpa [#allocation6], 1 }
 0x26a   :  { %557 = vsyncpa [#allocation4], 1 }
 0x26b   :  { %559 = vsyncpa [#allocation4 + $0x1], 1 }

</bundles_post_ra>
